<compile_context>
chip_gen: v5e
topology: v5e:2x2
jax: 0.10.0
libtpu: 0.0.40
codegen_flags: <defaults>
</compile_context>

<pallas_src>
import math

import jax
import jax.numpy as jnp
from jax.experimental import pallas as pl
from jax.experimental.pallas import tpu as pltpu


# ---------------------------------------------------------------------------
# Kernel bodies
# ---------------------------------------------------------------------------
def _make_matmul_kernel(slope):
    """Fused (rows x K) @ (K x N) + bias [+ LeakyReLU].  slope=None -> plain linear."""

    def kernel(a_ref, w_ref, b_ref, o_ref):
        acc = jnp.dot(a_ref[...], w_ref[...], preferred_element_type=jnp.float32)
        acc = acc + b_ref[...]                       # bias broadcast over rows
        if slope is not None:
            acc = jnp.maximum(acc, slope * acc)      # LeakyReLU == single vmax on the VPU
        o_ref[...] = acc.astype(o_ref.dtype)

    return kernel


def _make_conv_linear_kernel(slope):
    """Fused tail: (rows x Kc) @ Wc + bc -> LeakyReLU -> @ Wl + bl, all on-chip."""

    def kernel(a_ref, wc_ref, bc_ref, wl_ref, bl_ref, o_ref):
        h = jnp.dot(a_ref[...], wc_ref[...], preferred_element_type=jnp.float32)
        h = h + bc_ref[...]
        h = jnp.maximum(h, slope * h)                # LeakyReLU
        out = jnp.dot(h.astype(wl_ref.dtype), wl_ref[...],
                      preferred_element_type=jnp.float32)
        o_ref[...] = (out + bl_ref[...]).astype(o_ref.dtype)

    return kernel


# ---------------------------------------------------------------------------
# Tiling helper
# ---------------------------------------------------------------------------
def _pick_row_tile(M, per_row_elems, fixed_elems, itemsize,
                   budget_bytes=20 * 1024 * 1024, cap=1024):
    """Pick a large row tile (amortizes the ~0.35us per-grid-step overhead) while
    keeping the double-buffered footprint inside scoped VMEM on every TPU
    generation (v5e/v6e: 128 MiB physical, v7x: 64 MiB; scoped default 16-32 MiB)."""
    fixed = 2 * fixed_elems * itemsize               # resident weight + bias buffers
    per_row = 2 * per_row_elems * itemsize           # double-buffered A row + out row (+ h)
    avail = budget_bytes - fixed
    tm = avail // per_row if avail > 0 else 8
    tm = int(max(8, min(tm, cap)))
    if M <= tm:
        return M, M                                  # one full-extent tile, no padding
    tm -= tm % 8                                     # keep the sublane dim 8-aligned
    n_tiles = -(-M // tm)                            # cdiv
    return tm, n_tiles * tm


def _common_compiler_params():
    return pltpu.CompilerParams(
        dimension_semantics=("parallel",),           # independent row tiles -> both TCs
        vmem_limit_bytes=32 * 1024 * 1024,
    )


# ---------------------------------------------------------------------------
# pallas_call wrappers
# ---------------------------------------------------------------------------
def _linear_act(a, w, b, *, slope):
    """a: (M, K), w: (K, N), b: (1, N) -> (M, N), one pallas_call."""
    M, K = a.shape
    Kw, N = w.shape
    assert K == Kw and b.shape == (1, N)

    itemsize = jnp.dtype(a.dtype).itemsize
    tm, Mp = _pick_row_tile(M, per_row_elems=K + N, fixed_elems=K * N + N,
                            itemsize=itemsize)
    if Mp != M:                                      # pad tail rows instead of asserting
        a = jnp.pad(a, ((0, Mp - M), (0, 0)))

    out = pl.pallas_call(
        _make_matmul_kernel(slope),
        out_shape=jax.ShapeDtypeStruct((Mp, N), a.dtype),
        grid_spec=pltpu.PrefetchScalarGridSpec(
            num_scalar_prefetch=0,
            grid=(Mp // tm,),
            in_specs=[
                pl.BlockSpec((tm, K), lambda i: (i, 0)),   # row tile of patches / x
                pl.BlockSpec((K, N), lambda i: (0, 0)),    # whole weight, resident
                pl.BlockSpec((1, N), lambda i: (0, 0)),    # bias, resident
            ],
            out_specs=pl.BlockSpec((tm, N), lambda i: (i, 0)),
        ),
        compiler_params=_common_compiler_params(),
    )(a, w, b)
    return out if Mp == M else out[:M]


def _fused_conv_linear(a, w_conv, b_conv, w_lin, b_lin, *, slope):
    """Fused last conv (as GEMM) + LeakyReLU + EqualLinear in one pallas_call.
    a: (M, Kc), w_conv: (Kc, Nc), w_lin: (Nc, Nl) -> (M, Nl)."""
    M, Kc = a.shape
    Kc2, Nc = w_conv.shape
    Nc2, Nl = w_lin.shape
    assert Kc == Kc2 and Nc == Nc2
    assert b_conv.shape == (1, Nc) and b_lin.shape == (1, Nl)

    itemsize = jnp.dtype(a.dtype).itemsize
    tm, Mp = _pick_row_tile(
        M,
        per_row_elems=Kc + Nc + Nl,                       # A row + intermediate + out row
        fixed_elems=Kc * Nc + Nc + Nc * Nl + Nl,          # both weights + both biases
        itemsize=itemsize,
    )
    if Mp != M:
        a = jnp.pad(a, ((0, Mp - M), (0, 0)))

    out = pl.pallas_call(
        _make_conv_linear_kernel(slope),
        out_shape=jax.ShapeDtypeStruct((Mp, Nl), a.dtype),
        grid_spec=pltpu.PrefetchScalarGridSpec(
            num_scalar_prefetch=0,
            grid=(Mp // tm,),
            in_specs=[
                pl.BlockSpec((tm, Kc), lambda i: (i, 0)),  # row tile of patches
                pl.BlockSpec((Kc, Nc), lambda i: (0, 0)),  # conv weight, resident
                pl.BlockSpec((1, Nc), lambda i: (0, 0)),   # conv bias, resident
                pl.BlockSpec((Nc, Nl), lambda i: (0, 0)),  # linear weight, resident
                pl.BlockSpec((1, Nl), lambda i: (0, 0)),   # linear bias, resident
            ],
            out_specs=pl.BlockSpec((tm, Nl), lambda i: (i, 0)),
        ),
        compiler_params=_common_compiler_params(),
    )(a, w_conv, b_conv, w_lin, b_lin)
    return out if Mp == M else out[:M]


# ---------------------------------------------------------------------------
# Wrapper-side layout plumbing (im2col for stride-2 / pad-1 / 3x3 convolution)
# ---------------------------------------------------------------------------
def _extract_patches(x_nhwc):
    """(B, H, W, C) -> ((B*OH*OW, 9*C), OH, OW) for a 3x3, stride-2, pad-1 conv.
    Ordering is (kh, kw) major, channel minor, matching the prepared weights."""
    B, H, W, C = x_nhwc.shape
    OH, OW = (H + 1) // 2, (W + 1) // 2
    xp = jnp.pad(x_nhwc, ((0, 0), (1, 1), (1, 1), (0, 0)))
    cols = []
    for kh in range(3):
        for kw in range(3):
            cols.append(xp[:, kh:kh + 2 * OH:2, kw:kw + 2 * OW:2, :])
    patches = jnp.concatenate(cols, axis=-1)             # (B, OH, OW, 9*C)
    return patches.reshape(B * OH * OW, 9 * C), OH, OW


def prepare_params(conv_ws, conv_bs, w_lin, b_lin, lr_mul=1.0):
    """One-time prep outside the hot path: conv weights (Cout, Cin, 3, 3) ->
    GEMM layout (9*Cin, Cout); fold the EqualLinear equalization scale into
    its weight; biases to (1, N)."""
    prep_ws = [jnp.transpose(w, (2, 3, 1, 0)).reshape(9 * w.shape[1], w.shape[0])
               for w in conv_ws]
    prep_bs = [b.reshape(1, -1) for b in conv_bs]
    in_dim = w_lin.shape[1]
    scale = (1.0 / math.sqrt(in_dim)) * lr_mul
    w_lin_eff = (w_lin * scale).T                         # (in_dim, out_dim)
    b_lin_eff = (b_lin * lr_mul).reshape(1, -1)
    return prep_ws, prep_bs, w_lin_eff, b_lin_eff


def gradual_style_block_forward(x_nchw, prep_ws, prep_bs, w_lin_eff, b_lin_eff,
                                *, negative_slope=0.01):
    """x_nchw: (B, in_c, S, S) -> (B, out_c); matches GradualStyleBlock.forward
    (which collapses spatial to 1x1 for power-of-two `spatial`)."""
    out_c = w_lin_eff.shape[1]
    y = jnp.transpose(x_nchw, (0, 2, 3, 1))               # NHWC: channels on the lane axis
    n_convs = len(prep_ws)
    for li, (w2, b2) in enumerate(zip(prep_ws, prep_bs)):
        B = y.shape[0]
        patches, OH, OW = _extract_patches(y)
        if li == n_convs - 1:
            # Fuse final Conv2d + LeakyReLU + view(-1, out_c) + EqualLinear.
            return _fused_conv_linear(patches, w2, b2, w_lin_eff, b_lin_eff,
                                      slope=negative_slope)
        y = _linear_act(patches, w2, b2, slope=negative_slope)
        y = y.reshape(B, OH, OW, out_c)
    # No convs (degenerate spatial): just the EqualLinear on flattened channels.
    return _linear_act(y.reshape(-1, out_c), w_lin_eff, b_lin_eff, slope=None)


# ---------------------------------------------------------------------------
# Pure-JAX reference (lax conv) + demo
# ---------------------------------------------------------------------------
def _reference_forward(x, conv_ws, conv_bs, w_lin, b_lin, *,
                       negative_slope=0.01, lr_mul=1.0):
    y = x
    for w, b in zip(conv_ws, conv_bs):
        y = jax.lax.conv_general_dilated(
            y, w, window_strides=(2, 2), padding=((1, 1), (1, 1)),
            dimension_numbers=("NCHW", "OIHW", "NCHW"),
            precision=jax.lax.Precision.HIGHEST)
        y = y + b[None, :, None, None]
        y = jnp.where(y > 0, y, negative_slope * y)
    out_c = w_lin.shape[0]
    y = y.reshape(-1, out_c)
    scale = (1.0 / math.sqrt(w_lin.shape[1])) * lr_mul
    return jnp.dot(y, (w_lin * scale).T,
                   precision=jax.lax.Precision.HIGHEST) + b_lin * lr_mul


if __name__ == "__main__":
    # Small deterministic example: batch=2, in_c=4, out_c=32, spatial=16
    # -> num_pools = 4 strided convs (16 -> 8 -> 4 -> 2 -> 1) + EqualLinear(32, 32).
    B, in_c, out_c, spatial = 2, 4, 32, 16
    num_pools = int(math.log2(spatial))

    key = jax.random.PRNGKey(0)
    key, kx = jax.random.split(key)
    x = jax.random.normal(kx, (B, in_c, spatial, spatial), dtype=jnp.float32)

    conv_ws, conv_bs = [], []
    cin = in_c
    for _ in range(num_pools):
        key, k1, k2 = jax.random.split(key, 3)
        bound = 1.0 / math.sqrt(cin * 9)                  # Conv2d default init range
        conv_ws.append(jax.random.uniform(k1, (out_c, cin, 3, 3), jnp.float32,
                                          minval=-bound, maxval=bound))
        conv_bs.append(jax.random.uniform(k2, (out_c,), jnp.float32,
                                          minval=-bound, maxval=bound))
        cin = out_c
    key, k3 = jax.random.split(key)
    w_lin = jax.random.normal(k3, (out_c, out_c), dtype=jnp.float32)  # EqualLinear: randn / lr_mul
    b_lin = jnp.zeros((out_c,), dtype=jnp.float32)                    # EqualLinear: zeros

    params = prepare_params(conv_ws, conv_bs, w_lin, b_lin)
    fwd = jax.jit(lambda xx: gradual_style_block_forward(xx, *params))

    out = jax.block_until_ready(fwd(x))

    ref = _reference_forward(x, conv_ws, conv_bs, w_lin, b_lin)
    assert out.shape == (B, out_c)
    max_err = float(jnp.max(jnp.abs(out - ref)))
    assert jnp.allclose(out, ref, atol=5e-4, rtol=5e-4), f"max abs err = {max_err}"

    print("KERNEL_OK")
</pallas_src>

<mosaic_0001>
module attributes {stable_mosaic.version = 11 : i64} {
  func.func @kernel(%arg0: i32, %arg1: memref<128x36xf32, #tpu.memory_space<vmem>>, %arg2: memref<36x32xf32, #tpu.memory_space<vmem>>, %arg3: memref<1x32xf32, #tpu.memory_space<vmem>>, %arg4: memref<128x32xf32, #tpu.memory_space<vmem>>) attributes {dimension_semantics = [#tpu.dimension_semantics<parallel>], iteration_bounds = array<i64: 1>, scalar_prefetch = 0 : i64, scratch_operands = 0 : i64, tpu.core_type = #tpu.core_type<tc>, window_params = [{transform_indices = @transform_0, window_bounds = array<i64: 128, 36>}, {pipeline_mode = #tpu.pipeline_mode<synchronous>, transform_indices = @transform_1, window_bounds = array<i64: 36, 32>}, {pipeline_mode = #tpu.pipeline_mode<synchronous>, transform_indices = @transform_2, window_bounds = array<i64: 1, 32>}, {transform_indices = @transform_3, window_bounds = array<i64: 128, 32>}]} {
    %c0 = arith.constant 0 : index
    %c0_0 = arith.constant 0 : index
    %0 = vector.load %arg1[%c0, %c0_0] : memref<128x36xf32, #tpu.memory_space<vmem>>, vector<128x36xf32>
    %c0_1 = arith.constant 0 : index
    %c0_2 = arith.constant 0 : index
    %1 = vector.load %arg2[%c0_1, %c0_2] : memref<36x32xf32, #tpu.memory_space<vmem>>, vector<36x32xf32>
    %cst = arith.constant dense<0.000000e+00> : vector<128x32xf32>
    %2 = tpu.matmul %0, %1, %cst {dimension_numbers = #tpu.dot_dimension_numbers<[1], [0], [0], [1], [0, 0, 1, 1], [], []>} : vector<128x36xf32>, vector<36x32xf32>, vector<128x32xf32> -> vector<128x32xf32>
    %c0_3 = arith.constant 0 : index
    %c0_4 = arith.constant 0 : index
    %3 = vector.load %arg3[%c0_3, %c0_4] : memref<1x32xf32, #tpu.memory_space<vmem>>, vector<1x32xf32>
    %4 = vector.broadcast %3 : vector<1x32xf32> to vector<128x32xf32>
    %5 = arith.addf %2, %4 : vector<128x32xf32>
    %cst_5 = arith.constant 0.00999999977 : f32
    %6 = vector.broadcast %cst_5 : f32 to vector<128x32xf32>
    %7 = arith.mulf %6, %5 : vector<128x32xf32>
    %8 = arith.maximumf %5, %7 : vector<128x32xf32>
    %c0_6 = arith.constant 0 : index
    %c0_7 = arith.constant 0 : index
    %9 = vector.load %arg4[%c0_6, %c0_7] : memref<128x32xf32, #tpu.memory_space<vmem>>, vector<128x32xf32>
    tpu.vector_store %arg4[%c0_6, %c0_7], %8 {strides = array<i32>} : memref<128x32xf32, #tpu.memory_space<vmem>>, vector<128x32xf32>,
    return
  }
  func.func @transform_0(%arg0: i32) -> (i32, i32) {
    %c0_i32 = arith.constant 0 : i32
    %c0_i32_0 = arith.constant 0 : i32
    return %arg0, %c0_i32 : i32, i32
  }
  func.func @transform_1(%arg0: i32) -> (i32, i32) {
    %c0_i32 = arith.constant 0 : i32
    %c0_i32_0 = arith.constant 0 : i32
    %c0_i32_1 = arith.constant 0 : i32
    return %c0_i32, %c0_i32_0 : i32, i32
  }
  func.func @transform_2(%arg0: i32) -> (i32, i32) {
    %c0_i32 = arith.constant 0 : i32
    %c0_i32_0 = arith.constant 0 : i32
    %c0_i32_1 = arith.constant 0 : i32
    return %c0_i32, %c0_i32_0 : i32, i32
  }
  func.func @transform_3(%arg0: i32) -> (i32, i32) {
    %c0_i32 = arith.constant 0 : i32
    %c0_i32_0 = arith.constant 0 : i32
    return %arg0, %c0_i32 : i32, i32
  }
}

module attributes {stable_mosaic.version = 11 : i64} {
  func.func @kernel(%arg0: i32, %arg1: memref<32x288xf32, #tpu.memory_space<vmem>>, %arg2: memref<288x32xf32, #tpu.memory_space<vmem>>, %arg3: memref<1x32xf32, #tpu.memory_space<vmem>>, %arg4: memref<32x32xf32, #tpu.memory_space<vmem>>) attributes {dimension_semantics = [#tpu.dimension_semantics<parallel>], iteration_bounds = array<i64: 1>, scalar_prefetch = 0 : i64, scratch_operands = 0 : i64, tpu.core_type = #tpu.core_type<tc>, window_params = [{transform_indices = @transform_0, window_bounds = array<i64: 32, 288>}, {pipeline_mode = #tpu.pipeline_mode<synchronous>, transform_indices = @transform_1, window_bounds = array<i64: 288, 32>}, {pipeline_mode = #tpu.pipeline_mode<synchronous>, transform_indices = @transform_2, window_bounds = array<i64: 1, 32>}, {transform_indices = @transform_3, window_bounds = array<i64: 32, 32>}]} {
    %c0 = arith.constant 0 : index
    %c0_0 = arith.constant 0 : index
    %0 = vector.load %arg1[%c0, %c0_0] : memref<32x288xf32, #tpu.memory_space<vmem>>, vector<32x288xf32>
    %c0_1 = arith.constant 0 : index
    %c0_2 = arith.constant 0 : index
    %1 = vector.load %arg2[%c0_1, %c0_2] : memref<288x32xf32, #tpu.memory_space<vmem>>, vector<288x32xf32>
    %cst = arith.constant dense<0.000000e+00> : vector<32x32xf32>
    %2 = tpu.matmul %0, %1, %cst {dimension_numbers = #tpu.dot_dimension_numbers<[1], [0], [0], [1], [0, 0, 1, 1], [], []>} : vector<32x288xf32>, vector<288x32xf32>, vector<32x32xf32> -> vector<32x32xf32>
    %c0_3 = arith.constant 0 : index
    %c0_4 = arith.constant 0 : index
    %3 = vector.load %arg3[%c0_3, %c0_4] : memref<1x32xf32, #tpu.memory_space<vmem>>, vector<1x32xf32>
    %4 = vector.broadcast %3 : vector<1x32xf32> to vector<32x32xf32>
    %5 = arith.addf %2, %4 : vector<32x32xf32>
    %cst_5 = arith.constant 0.00999999977 : f32
    %6 = vector.broadcast %cst_5 : f32 to vector<32x32xf32>
    %7 = arith.mulf %6, %5 : vector<32x32xf32>
    %8 = arith.maximumf %5, %7 : vector<32x32xf32>
    %c0_6 = arith.constant 0 : index
    %c0_7 = arith.constant 0 : index
    %9 = vector.load %arg4[%c0_6, %c0_7] : memref<32x32xf32, #tpu.memory_space<vmem>>, vector<32x32xf32>
    tpu.vector_store %arg4[%c0_6, %c0_7], %8 {strides = array<i32>} : memref<32x32xf32, #tpu.memory_space<vmem>>, vector<32x32xf32>,
    return
  }
  func.func @transform_0(%arg0: i32) -> (i32, i32) {
    %c0_i32 = arith.constant 0 : i32
    %c0_i32_0 = arith.constant 0 : i32
    return %arg0, %c0_i32 : i32, i32
  }
  func.func @transform_1(%arg0: i32) -> (i32, i32) {
    %c0_i32 = arith.constant 0 : i32
    %c0_i32_0 = arith.constant 0 : i32
    %c0_i32_1 = arith.constant 0 : i32
    return %c0_i32, %c0_i32_0 : i32, i32
  }
  func.func @transform_2(%arg0: i32) -> (i32, i32) {
    %c0_i32 = arith.constant 0 : i32
    %c0_i32_0 = arith.constant 0 : i32
    %c0_i32_1 = arith.constant 0 : i32
    return %c0_i32, %c0_i32_0 : i32, i32
  }
  func.func @transform_3(%arg0: i32) -> (i32, i32) {
    %c0_i32 = arith.constant 0 : i32
    %c0_i32_0 = arith.constant 0 : i32
    return %arg0, %c0_i32 : i32, i32
  }
}

module attributes {stable_mosaic.version = 11 : i64} {
  func.func @kernel(%arg0: i32, %arg1: memref<8x288xf32, #tpu.memory_space<vmem>>, %arg2: memref<288x32xf32, #tpu.memory_space<vmem>>, %arg3: memref<1x32xf32, #tpu.memory_space<vmem>>, %arg4: memref<8x32xf32, #tpu.memory_space<vmem>>) attributes {dimension_semantics = [#tpu.dimension_semantics<parallel>], iteration_bounds = array<i64: 1>, scalar_prefetch = 0 : i64, scratch_operands = 0 : i64, tpu.core_type = #tpu.core_type<tc>, window_params = [{transform_indices = @transform_0, window_bounds = array<i64: 8, 288>}, {pipeline_mode = #tpu.pipeline_mode<synchronous>, transform_indices = @transform_1, window_bounds = array<i64: 288, 32>}, {pipeline_mode = #tpu.pipeline_mode<synchronous>, transform_indices = @transform_2, window_bounds = array<i64: 1, 32>}, {transform_indices = @transform_3, window_bounds = array<i64: 8, 32>}]} {
    %c0 = arith.constant 0 : index
    %c0_0 = arith.constant 0 : index
    %0 = vector.load %arg1[%c0, %c0_0] : memref<8x288xf32, #tpu.memory_space<vmem>>, vector<8x288xf32>
    %c0_1 = arith.constant 0 : index
    %c0_2 = arith.constant 0 : index
    %1 = vector.load %arg2[%c0_1, %c0_2] : memref<288x32xf32, #tpu.memory_space<vmem>>, vector<288x32xf32>
    %cst = arith.constant dense<0.000000e+00> : vector<8x32xf32>
    %2 = tpu.matmul %0, %1, %cst {dimension_numbers = #tpu.dot_dimension_numbers<[1], [0], [0], [1], [0, 0, 1, 1], [], []>} : vector<8x288xf32>, vector<288x32xf32>, vector<8x32xf32> -> vector<8x32xf32>
    %c0_3 = arith.constant 0 : index
    %c0_4 = arith.constant 0 : index
    %3 = vector.load %arg3[%c0_3, %c0_4] : memref<1x32xf32, #tpu.memory_space<vmem>>, vector<1x32xf32>
    %4 = vector.broadcast %3 : vector<1x32xf32> to vector<8x32xf32>
    %5 = arith.addf %2, %4 : vector<8x32xf32>
    %cst_5 = arith.constant 0.00999999977 : f32
    %6 = vector.broadcast %cst_5 : f32 to vector<8x32xf32>
    %7 = arith.mulf %6, %5 : vector<8x32xf32>
    %8 = arith.maximumf %5, %7 : vector<8x32xf32>
    %c0_6 = arith.constant 0 : index
    %c0_7 = arith.constant 0 : index
    %9 = vector.load %arg4[%c0_6, %c0_7] : memref<8x32xf32, #tpu.memory_space<vmem>>, vector<8x32xf32>
    tpu.vector_store %arg4[%c0_6, %c0_7], %8 {strides = array<i32>} : memref<8x32xf32, #tpu.memory_space<vmem>>, vector<8x32xf32>,
    return
  }
  func.func @transform_0(%arg0: i32) -> (i32, i32) {
    %c0_i32 = arith.constant 0 : i32
    %c0_i32_0 = arith.constant 0 : i32
    return %arg0, %c0_i32 : i32, i32
  }
  func.func @transform_1(%arg0: i32) -> (i32, i32) {
    %c0_i32 = arith.constant 0 : i32
    %c0_i32_0 = arith.constant 0 : i32
    %c0_i32_1 = arith.constant 0 : i32
    return %c0_i32, %c0_i32_0 : i32, i32
  }
  func.func @transform_2(%arg0: i32) -> (i32, i32) {
    %c0_i32 = arith.constant 0 : i32
    %c0_i32_0 = arith.constant 0 : i32
    %c0_i32_1 = arith.constant 0 : i32
    return %c0_i32, %c0_i32_0 : i32, i32
  }
  func.func @transform_3(%arg0: i32) -> (i32, i32) {
    %c0_i32 = arith.constant 0 : i32
    %c0_i32_0 = arith.constant 0 : i32
    return %arg0, %c0_i32 : i32, i32
  }
}

module attributes {stable_mosaic.version = 11 : i64} {
  func.func @kernel(%arg0: i32, %arg1: memref<2x288xf32, #tpu.memory_space<vmem>>, %arg2: memref<288x32xf32, #tpu.memory_space<vmem>>, %arg3: memref<1x32xf32, #tpu.memory_space<vmem>>, %arg4: memref<32x32xf32, #tpu.memory_space<vmem>>, %arg5: memref<1x32xf32, #tpu.memory_space<vmem>>, %arg6: memref<2x32xf32, #tpu.memory_space<vmem>>) attributes {dimension_semantics = [#tpu.dimension_semantics<parallel>], iteration_bounds = array<i64: 1>, scalar_prefetch = 0 : i64, scratch_operands = 0 : i64, tpu.core_type = #tpu.core_type<tc>, window_params = [{transform_indices = @transform_0, window_bounds = array<i64: 2, 288>}, {pipeline_mode = #tpu.pipeline_mode<synchronous>, transform_indices = @transform_1, window_bounds = array<i64: 288, 32>}, {pipeline_mode = #tpu.pipeline_mode<synchronous>, transform_indices = @transform_2, window_bounds = array<i64: 1, 32>}, {pipeline_mode = #tpu.pipeline_mode<synchronous>, transform_indices = @transform_3, window_bounds = array<i64: 32, 32>}, {pipeline_mode = #tpu.pipeline_mode<synchronous>, transform_indices = @transform_4, window_bounds = array<i64: 1, 32>}, {transform_indices = @transform_5, window_bounds = array<i64: 2, 32>}]} {
    %c0 = arith.constant 0 : index
    %c0_0 = arith.constant 0 : index
    %0 = vector.load %arg1[%c0, %c0_0] : memref<2x288xf32, #tpu.memory_space<vmem>>, vector<2x288xf32>
    %c0_1 = arith.constant 0 : index
    %c0_2 = arith.constant 0 : index
    %1 = vector.load %arg2[%c0_1, %c0_2] : memref<288x32xf32, #tpu.memory_space<vmem>>, vector<288x32xf32>
    %cst = arith.constant dense<0.000000e+00> : vector<2x32xf32>
    %2 = tpu.matmul %0, %1, %cst {dimension_numbers = #tpu.dot_dimension_numbers<[1], [0], [0], [1], [0, 0, 1, 1], [], []>} : vector<2x288xf32>, vector<288x32xf32>, vector<2x32xf32> -> vector<2x32xf32>
    %c0_3 = arith.constant 0 : index
    %c0_4 = arith.constant 0 : index
    %3 = vector.load %arg3[%c0_3, %c0_4] : memref<1x32xf32, #tpu.memory_space<vmem>>, vector<1x32xf32>
    %4 = vector.broadcast %3 : vector<1x32xf32> to vector<2x32xf32>
    %5 = arith.addf %2, %4 : vector<2x32xf32>
    %cst_5 = arith.constant 0.00999999977 : f32
    %6 = vector.broadcast %cst_5 : f32 to vector<2x32xf32>
    %7 = arith.mulf %6, %5 : vector<2x32xf32>
    %8 = arith.maximumf %5, %7 : vector<2x32xf32>
    %c0_6 = arith.constant 0 : index
    %c0_7 = arith.constant 0 : index
    %9 = vector.load %arg4[%c0_6, %c0_7] : memref<32x32xf32, #tpu.memory_space<vmem>>, vector<32x32xf32>
    %cst_8 = arith.constant dense<0.000000e+00> : vector<2x32xf32>
    %10 = tpu.matmul %8, %9, %cst_8 {dimension_numbers = #tpu.dot_dimension_numbers<[1], [0], [0], [1], [0, 0, 1, 1], [], []>} : vector<2x32xf32>, vector<32x32xf32>, vector<2x32xf32> -> vector<2x32xf32>
    %c0_9 = arith.constant 0 : index
    %c0_10 = arith.constant 0 : index
    %11 = vector.load %arg5[%c0_9, %c0_10] : memref<1x32xf32, #tpu.memory_space<vmem>>, vector<1x32xf32>
    %12 = vector.broadcast %11 : vector<1x32xf32> to vector<2x32xf32>
    %13 = arith.addf %10, %12 : vector<2x32xf32>
    %c0_11 = arith.constant 0 : index
    %c0_12 = arith.constant 0 : index
    %14 = vector.load %arg6[%c0_11, %c0_12] : memref<2x32xf32, #tpu.memory_space<vmem>>, vector<2x32xf32>
    tpu.vector_store %arg6[%c0_11, %c0_12], %13 {strides = array<i32>} : memref<2x32xf32, #tpu.memory_space<vmem>>, vector<2x32xf32>,
    return
  }
  func.func @transform_0(%arg0: i32) -> (i32, i32) {
    %c0_i32 = arith.constant 0 : i32
    %c0_i32_0 = arith.constant 0 : i32
    return %arg0, %c0_i32 : i32, i32
  }
  func.func @transform_1(%arg0: i32) -> (i32, i32) {
    %c0_i32 = arith.constant 0 : i32
    %c0_i32_0 = arith.constant 0 : i32
    %c0_i32_1 = arith.constant 0 : i32
    return %c0_i32, %c0_i32_0 : i32, i32
  }
  func.func @transform_2(%arg0: i32) -> (i32, i32) {
    %c0_i32 = arith.constant 0 : i32
    %c0_i32_0 = arith.constant 0 : i32
    %c0_i32_1 = arith.constant 0 : i32
    return %c0_i32, %c0_i32_0 : i32, i32
  }
  func.func @transform_3(%arg0: i32) -> (i32, i32) {
    %c0_i32 = arith.constant 0 : i32
    %c0_i32_0 = arith.constant 0 : i32
    %c0_i32_1 = arith.constant 0 : i32
    return %c0_i32, %c0_i32_0 : i32, i32
  }
  func.func @transform_4(%arg0: i32) -> (i32, i32) {
    %c0_i32 = arith.constant 0 : i32
    %c0_i32_0 = arith.constant 0 : i32
    %c0_i32_1 = arith.constant 0 : i32
    return %c0_i32, %c0_i32_0 : i32, i32
  }
  func.func @transform_5(%arg0: i32) -> (i32, i32) {
    %c0_i32 = arith.constant 0 : i32
    %c0_i32_0 = arith.constant 0 : i32
    return %arg0, %c0_i32 : i32, i32
  }
}

</mosaic_0001>

<bundles_post_ra>
// kernel: _lambda_.4
= control target key start
LH: loop header
LB: loop body
LE: loop exit
PB: predicated region body
PF: predicated region fallthrough
CT: control target
= control target key end

     0   :  { %vm88_vm0 = vcmask 1043456   ;;  %vm39_vm1 = vcmask 293888   ;;  %vm189_vm2 = vcmask 261120   ;;  %s427_s1 = inlined_call_operand.vmem [shape: f32[36,32], index: 1, kind: input, shape index: {}]   ;;  %s428_s0 = inlined_call_operand.vmem [shape: f32[128,36], index: 0, kind: input, shape index: {}]   ;;  %s429_s2 = inlined_call_operand.vmem [shape: f32[1,32], index: 2, kind: input, shape index: {}]   ;;  %s430_s3 = inlined_call_operand.vmem [shape: f32[128,32], index: 3, kind: output, shape index: {}]  }
   0x1   :  { %v34_v0 = vld [vmem:[%s427_s1 + $0x20] sm:$0xf]  ;;  %v33_v1 = vld [vmem:[%s427_s1 + $0x18] sm:$0xff]  ;;  %v32_v2 = vld [vmem:[%s427_s1 + $0x10] sm:$0xff] }
   0x2   :  { %228 = vmatpush.msk.msra.mxu2 %vm88_vm0, %v34_v0  ;;  %229 = vmatpush.msk.msra.mxu3 %vm88_vm0, %v34_v0  ;;  %v31_v3 = vld [vmem:[%s427_s1 + $0x8] sm:$0xff]  ;;  %v30_v4 = vld [vmem:[%s427_s1] sm:$0xff]  ;;  %v24_v13 = vld [vmem:[%s428_s0 + $0x50] sm:$0xff] }
   0x3   :  { %210 = vmatpush.msk.msra.mxu0 %vm88_vm0, %v34_v0  ;;  %227 = vmatpush.msk.msra.mxu1 %vm88_vm0, %v34_v0  ;;  %v22_v5 = vld [vmem:[%s428_s0 + $0x40] sm:$0xff]  ;;  %v23_v9 = vld [vmem:[%s428_s0 + $0x48] sm:$0xff]  ;;  %v28_v14 = vld [vmem:[%s428_s0 + $0x70] sm:$0xff] }
   0x4   :  { %231 = vmatpush.msra.mxu2 %v33_v1  ;;  %232 = vmatpush.msra.mxu3 %v33_v1  ;;  %v26_v6 = vld [vmem:[%s428_s0 + $0x60] sm:$0xff]  ;;  %v27_v10 = vld [vmem:[%s428_s0 + $0x68] sm:$0xff]  ;;  %v16_v15 = vld [vmem:[%s428_s0 + $0x10] sm:$0xff] }
   0x5   :  { %104 = vmatpush.msra.mxu0 %v33_v1  ;;  %230 = vmatpush.msra.mxu1 %v33_v1  ;;  %v14_v7 = vld [vmem:[%s428_s0] sm:$0xff]  ;;  %v15_v11 = vld [vmem:[%s428_s0 + $0x8] sm:$0xff]  ;;  %v20_v16 = vld [vmem:[%s428_s0 + $0x30] sm:$0xff] }
   0x6   :  { %234 = vmatpush.msra.mxu2 %v32_v2  ;;  %235 = vmatpush.msra.mxu3 %v32_v2  ;;  %v18_v8 = vld [vmem:[%s428_s0 + $0x20] sm:$0xff]  ;;  %v19_v12 = vld [vmem:[%s428_s0 + $0x28] sm:$0xff]  ;;  %v25_v17 = vld [vmem:[%s428_s0 + $0x58] sm:$0xff] }
   0x7   :  { %105 = vmatpush.msra.mxu0 %v32_v2  ;;  %233 = vmatpush.msra.mxu1 %v32_v2  ;;  %v29_v18 = vld [vmem:[%s428_s0 + $0x78] sm:$0xff]  ;;  %v345_v21 = vld [vmem:[%s429_s2] ss:$0 sm:$0xff] }
   0x8   :  { %237 = vmatpush.msra.mxu2 %v31_v3  ;;  %238 = vmatpush.msra.mxu3 %v31_v3  ;;  %v17_v19 = vld [vmem:[%s428_s0 + $0x18] sm:$0xff] }
   0x9   :  { %106 = vmatpush.msra.mxu0 %v31_v3  ;;  %236 = vmatpush.msra.mxu1 %v31_v3  ;;  %v21_v20 = vld [vmem:[%s428_s0 + $0x38] sm:$0xff] }
   0xa   :  { %240 = vmatpush.msra.mxu2 %v30_v4  ;;  %241 = vmatpush.msra.mxu3 %v30_v4 }
   0xb   :  { %219 = vmatmul.msk.f32.vlgmr.msra.gmra.mxu2 %vm39_vm1, %v22_v5  ;;  %223 = vmatmul.msk.f32.vlgmr.msra.gmra.mxu3 %vm39_vm1, %v26_v6 }
   0xc   :  { %107 = vmatpush.msra.mxu0 %v30_v4  ;;  %239 = vmatpush.msra.mxu1 %v30_v4 }
   0xd   :  { %211 = vmatmul.msk.f32.vlgmr.msra.gmra.mxu0 %vm39_vm1, %v14_v7  ;;  %215 = vmatmul.msk.f32.vlgmr.msra.gmra.mxu1 %vm39_vm1, %v18_v8 }
  0x13   :  { %220 = vmatmul.msk.f32.gmra.mxu2 %vm39_vm1, %v23_v9  ;;  %224 = vmatmul.msk.f32.gmra.mxu3 %vm39_vm1, %v27_v10 }
  0x15   :  { %212 = vmatmul.msk.f32.gmra.mxu0 %vm39_vm1, %v15_v11  ;;  %216 = vmatmul.msk.f32.gmra.mxu1 %vm39_vm1, %v19_v12 }
  0x1b   :  { %221 = vmatmul.msk.f32.gmra.mxu2 %vm39_vm1, %v24_v13  ;;  %225 = vmatmul.msk.f32.gmra.mxu3 %vm39_vm1, %v28_v14 }
  0x1d   :  { %213 = vmatmul.msk.f32.gmra.mxu0 %vm39_vm1, %v16_v15  ;;  %217 = vmatmul.msk.f32.gmra.mxu1 %vm39_vm1, %v20_v16 }
  0x23   :  { %222 = vmatmul.msk.f32.gmra.mxu2 %vm39_vm1, %v25_v17  ;;  %226 = vmatmul.msk.f32.gmra.mxu3 %vm39_vm1, %v29_v18 }
  0x25   :  { %214 = vmatmul.msk.f32.gmra.mxu0 %vm39_vm1, %v17_v19  ;;  %218 = vmatmul.msk.f32.gmra.mxu1 %vm39_vm1, %v21_v20 }
  0x8a   :  { %v109_v22 = vpop.f32.mrf.mxu0  ;;  %v121_v23 = vpop.f32.mrf.mxu1 }
  0x8b   :  { %v110_v24 = vadd.f32 %v345_v21, %v109_v22  ;;  %v122_v25 = vadd.f32 %v345_v21, %v121_v23 }
  0x8d   :  { %v157_v26 = vmul.f32 0.01, %v110_v24  ;;  %v161_v27 = vmul.f32 0.01, %v122_v25 }
  0x8e   :  { %v133_v28 = vpop.f32.mrf.mxu2  ;;  %v145_v29 = vpop.f32.mrf.mxu3 }
  0x8f   :  { %v173_v30 = vmax.f32 %v110_v24, %v157_v26  ;;  %v177_v31 = vmax.f32 %v122_v25, %v161_v27  ;;  %v134_v32 = vadd.f32 %v345_v21, %v133_v28  ;;  %v146_v33 = vadd.f32 %v345_v21, %v145_v29 }
  0x91   :  { %190 = vst.msk [vmem:[%s430_s3] sm:$0xff] %vm189_vm2, %v173_v30  ;;  %v165_v34 = vmul.f32 0.01, %v134_v32  ;;  %v169_v35 = vmul.f32 0.01, %v146_v33 }
  0x92   :  { %194 = vst.msk [vmem:[%s430_s3 + $0x20] sm:$0xff] %vm189_vm2, %v177_v31  ;;  %v112_v36 = vpop.f32.mrf.mxu0  ;;  %v124_v37 = vpop.f32.mrf.mxu1 }
  0x93   :  { %v181_v38 = vmax.f32 %v134_v32, %v165_v34  ;;  %v185_v39 = vmax.f32 %v146_v33, %v169_v35  ;;  %v113_v40 = vadd.f32 %v345_v21, %v112_v36  ;;  %v125_v41 = vadd.f32 %v345_v21, %v124_v37 }
  0x95   :  { %198 = vst.msk [vmem:[%s430_s3 + $0x40] sm:$0xff] %vm189_vm2, %v181_v38  ;;  %v158_v42 = vmul.f32 0.01, %v113_v40  ;;  %v162_v43 = vmul.f32 0.01, %v125_v41 }
  0x96   :  { %202 = vst.msk [vmem:[%s430_s3 + $0x60] sm:$0xff] %vm189_vm2, %v185_v39  ;;  %v136_v44 = vpop.f32.mrf.mxu2  ;;  %v148_v45 = vpop.f32.mrf.mxu3 }
  0x97   :  { %v174_v46 = vmax.f32 %v113_v40, %v158_v42  ;;  %v178_v47 = vmax.f32 %v125_v41, %v162_v43  ;;  %v137_v48 = vadd.f32 %v345_v21, %v136_v44  ;;  %v149_v49 = vadd.f32 %v345_v21, %v148_v45 }
  0x99   :  { %191 = vst.msk [vmem:[%s430_s3 + $0x8] sm:$0xff] %vm189_vm2, %v174_v46  ;;  %v166_v50 = vmul.f32 0.01, %v137_v48  ;;  %v170_v51 = vmul.f32 0.01, %v149_v49 }
  0x9a   :  { %195 = vst.msk [vmem:[%s430_s3 + $0x28] sm:$0xff] %vm189_vm2, %v178_v47  ;;  %v115_v52 = vpop.f32.mrf.mxu0  ;;  %v127_v53 = vpop.f32.mrf.mxu1 }
  0x9b   :  { %v182_v54 = vmax.f32 %v137_v48, %v166_v50  ;;  %v186_v55 = vmax.f32 %v149_v49, %v170_v51  ;;  %v116_v56 = vadd.f32 %v345_v21, %v115_v52  ;;  %v128_v57 = vadd.f32 %v345_v21, %v127_v53 }
  0x9d   :  { %199 = vst.msk [vmem:[%s430_s3 + $0x48] sm:$0xff] %vm189_vm2, %v182_v54  ;;  %v159_v58 = vmul.f32 0.01, %v116_v56  ;;  %v163_v59 = vmul.f32 0.01, %v128_v57 }
  0x9e   :  { %203 = vst.msk [vmem:[%s430_s3 + $0x68] sm:$0xff] %vm189_vm2, %v186_v55  ;;  %v139_v60 = vpop.f32.mrf.mxu2  ;;  %v151_v61 = vpop.f32.mrf.mxu3 }
  0x9f   :  { %v175_v62 = vmax.f32 %v116_v56, %v159_v58  ;;  %v179_v63 = vmax.f32 %v128_v57, %v163_v59  ;;  %v140_v0 = vadd.f32 %v345_v21, %v139_v60  ;;  %v152_v1 = vadd.f32 %v345_v21, %v151_v61 }
  0xa1   :  { %192 = vst.msk [vmem:[%s430_s3 + $0x10] sm:$0xff] %vm189_vm2, %v175_v62  ;;  %v167_v2 = vmul.f32 0.01, %v140_v0  ;;  %v171_v3 = vmul.f32 0.01, %v152_v1 }
  0xa2   :  { %196 = vst.msk [vmem:[%s430_s3 + $0x30] sm:$0xff] %vm189_vm2, %v179_v63  ;;  %v118_v4 = vpop.f32.mrf.mxu0  ;;  %v130_v5 = vpop.f32.mrf.mxu1 }
  0xa3   :  { %v183_v6 = vmax.f32 %v140_v0, %v167_v2  ;;  %v187_v7 = vmax.f32 %v152_v1, %v171_v3  ;;  %v119_v8 = vadd.f32 %v345_v21, %v118_v4  ;;  %v131_v9 = vadd.f32 %v345_v21, %v130_v5 }
  0xa5   :  { %200 = vst.msk [vmem:[%s430_s3 + $0x50] sm:$0xff] %vm189_vm2, %v183_v6  ;;  %v160_v10 = vmul.f32 0.01, %v119_v8  ;;  %v164_v11 = vmul.f32 0.01, %v131_v9 }
  0xa6   :  { %204 = vst.msk [vmem:[%s430_s3 + $0x70] sm:$0xff] %vm189_vm2, %v187_v7  ;;  %v142_v12 = vpop.f32.mrf.mxu2  ;;  %v154_v13 = vpop.f32.mrf.mxu3 }
  0xa7   :  { %v176_v14 = vmax.f32 %v119_v8, %v160_v10  ;;  %v180_v15 = vmax.f32 %v131_v9, %v164_v11  ;;  %v143_v16 = vadd.f32 %v345_v21, %v142_v12  ;;  %v155_v17 = vadd.f32 %v345_v21, %v154_v13 }
  0xa9   :  { %193 = vst.msk [vmem:[%s430_s3 + $0x18] sm:$0xff] %vm189_vm2, %v176_v14  ;;  %v168_v18 = vmul.f32 0.01, %v143_v16  ;;  %v172_v19 = vmul.f32 0.01, %v155_v17 }
  0xaa   :  { %197 = vst.msk [vmem:[%s430_s3 + $0x38] sm:$0xff] %vm189_vm2, %v180_v15 }
  0xab   :  { %v184_v20 = vmax.f32 %v143_v16, %v168_v18  ;;  %v188_v22 = vmax.f32 %v155_v17, %v172_v19 }
  0xad   :  { %201 = vst.msk [vmem:[%s430_s3 + $0x58] sm:$0xff] %vm189_vm2, %v184_v20 }
  0xae   :  { %205 = vst.msk [vmem:[%s430_s3 + $0x78] sm:$0xff] %vm189_vm2, %v188_v22 }

// kernel: _lambda_.5
= control target key start
LH: loop header
LB: loop body
LE: loop exit
PB: predicated region body
PF: predicated region fallthrough
CT: control target
= control target key end

     0   :  { %vm66_vm0 = vcmask 261120   ;;  %s390_s1 = inlined_call_operand.vmem [shape: f32[288,32], index: 1, kind: input, shape index: {}]   ;;  %s391_s0 = inlined_call_operand.vmem [shape: f32[32,288], index: 0, kind: input, shape index: {}]   ;;  %s392_s2 = inlined_call_operand.vmem [shape: f32[1,32], index: 2, kind: input, shape index: {}]   ;;  %s393_s3 = inlined_call_operand.vmem [shape: f32[32,32], index: 3, kind: output, shape index: {}]  }
   0x1   :  { %v41_v0 = vld [vmem:[%s390_s1 + $0x78] sm:$0xff]  ;;  %v40_v2 = vld [vmem:[%s390_s1 + $0x70] sm:$0xff]  ;;  %v39_v4 = vld [vmem:[%s390_s1 + $0x68] sm:$0xff] }
   0x2   :  { %v57_v1 = vld [vmem:[%s390_s1 + $0xf8] sm:$0xff]  ;;  %79 = vmatpush.msra.mxu0 %v41_v0  ;;  %186 = vmatpush.msra.mxu3 %v41_v0  ;;  %v56_v3 = vld [vmem:[%s390_s1 + $0xf0] sm:$0xff]  ;;  %v55_v5 = vld [vmem:[%s390_s1 + $0xe8] sm:$0xff] }
   0x3   :  { %108 = vmatpush.msra.mxu1 %v57_v1  ;;  %v38_v6 = vld [vmem:[%s390_s1 + $0x60] sm:$0xff]  ;;  %v37_v8 = vld [vmem:[%s390_s1 + $0x58] sm:$0xff]  ;;  %v36_v11 = vld [vmem:[%s390_s1 + $0x50] sm:$0xff] }
   0x4   :  { %80 = vmatpush.msra.mxu0 %v40_v2  ;;  %187 = vmatpush.msra.mxu3 %v40_v2  ;;  %v54_v7 = vld [vmem:[%s390_s1 + $0xe0] sm:$0xff]  ;;  %v53_v9 = vld [vmem:[%s390_s1 + $0xd8] sm:$0xff]  ;;  %v60_v12 = vld [vmem:[%s390_s1 + $0x110] sm:$0xff] }
   0x5   :  { %109 = vmatpush.msra.mxu1 %v56_v3  ;;  %v61_v10 = vld [vmem:[%s390_s1 + $0x118] sm:$0xff]  ;;  %v52_v13 = vld [vmem:[%s390_s1 + $0xd0] sm:$0xff]  ;;  %v59_v14 = vld [vmem:[%s390_s1 + $0x108] sm:$0xff] }
   0x6   :  { %81 = vmatpush.msra.mxu0 %v39_v4  ;;  %188 = vmatpush.msra.mxu3 %v39_v4  ;;  %v35_v15 = vld [vmem:[%s390_s1 + $0x48] sm:$0xff]  ;;  %v58_v17 = vld [vmem:[%s390_s1 + $0x100] sm:$0xff]  ;;  %v16_v20 = vld [vmem:[%s391_s0 + $0x10] sm:$0xff] }
   0x7   :  { %110 = vmatpush.msra.mxu1 %v55_v5  ;;  %149 = vmatpush.msra.mxu2 %v61_v10  ;;  %v51_v16 = vld [vmem:[%s390_s1 + $0xc8] sm:$0xff]  ;;  %v34_v18 = vld [vmem:[%s390_s1 + $0x40] sm:$0xff]  ;;  %v33_v21 = vld [vmem:[%s390_s1 + $0x38] sm:$0xff] }
   0x8   :  { %82 = vmatpush.msra.mxu0 %v38_v6  ;;  %189 = vmatpush.msra.mxu3 %v38_v6  ;;  %v50_v19 = vld [vmem:[%s390_s1 + $0xc0] sm:$0xff]  ;;  %v49_v22 = vld [vmem:[%s390_s1 + $0xb8] sm:$0xff]  ;;  %v32_v23 = vld [vmem:[%s390_s1 + $0x30] sm:$0xff] }
   0x9   :  { %111 = vmatpush.msra.mxu1 %v54_v7  ;;  %150 = vmatpush.msra.mxu2 %v60_v12  ;;  %v48_v24 = vld [vmem:[%s390_s1 + $0xb0] sm:$0xff]  ;;  %v31_v25 = vld [vmem:[%s390_s1 + $0x28] sm:$0xff]  ;;  %v30_v27 = vld [vmem:[%s390_s1 + $0x20] sm:$0xff] }
   0xa   :  { %83 = vmatpush.msra.mxu0 %v37_v8  ;;  %190 = vmatpush.msra.mxu3 %v37_v8  ;;  %v47_v26 = vld [vmem:[%s390_s1 + $0xa8] sm:$0xff]  ;;  %v46_v28 = vld [vmem:[%s390_s1 + $0xa0] sm:$0xff]  ;;  %v29_v30 = vld [vmem:[%s390_s1 + $0x18] sm:$0xff] }
   0xb   :  { %112 = vmatpush.msra.mxu1 %v53_v9  ;;  %151 = vmatpush.msra.mxu2 %v59_v14  ;;  %v19_v29 = vld [vmem:[%s391_s0 + $0x28] sm:$0xff]  ;;  %v45_v31 = vld [vmem:[%s390_s1 + $0x98] sm:$0xff]  ;;  %v28_v32 = vld [vmem:[%s390_s1 + $0x10] sm:$0xff] }
   0xc   :  { %84 = vmatpush.msra.mxu0 %v36_v11  ;;  %191 = vmatpush.msra.mxu3 %v36_v11  ;;  %v44_v33 = vld [vmem:[%s390_s1 + $0x90] sm:$0xff]  ;;  %v27_v34 = vld [vmem:[%s390_s1 + $0x8] sm:$0xff]  ;;  %v26_v36 = vld [vmem:[%s390_s1] sm:$0xff] }
   0xd   :  { %113 = vmatpush.msra.mxu1 %v52_v13  ;;  %152 = vmatpush.msra.mxu2 %v58_v17  ;;  %v43_v35 = vld [vmem:[%s390_s1 + $0x88] sm:$0xff]  ;;  %v42_v37 = vld [vmem:[%s390_s1 + $0x80] sm:$0xff]  ;;  %v17_v39 = vld [vmem:[%s391_s0 + $0x18] sm:$0xff] }
   0xe   :  { %85 = vmatpush.msra.mxu0 %v35_v15  ;;  %192 = vmatpush.msra.mxu3 %v35_v15  ;;  %v14_v38 = vld [vmem:[%s391_s0] sm:$0xff]  ;;  %v15_v40 = vld [vmem:[%s391_s0 + $0x8] sm:$0xff]  ;;  %v20_v42 = vld [vmem:[%s391_s0 + $0x30] sm:$0xff] }
   0xf   :  { %114 = vmatpush.msra.mxu1 %v51_v16  ;;  %182 = vmatmul.msk.f32.vlgmr.msra.gmra.mxu2 %vm66_vm0, %v16_v20  ;;  %v22_v41 = vld [vmem:[%s391_s0 + $0x40] sm:$0xff]  ;;  %v25_v44 = vld [vmem:[%s391_s0 + $0x58] sm:$0xff]  ;;  %v23_v45 = vld [vmem:[%s391_s0 + $0x48] sm:$0xff] }
  0x10   :  { %86 = vmatpush.msra.mxu0 %v34_v18  ;;  %193 = vmatpush.msra.mxu3 %v34_v18  ;;  %v18_v43 = vld [vmem:[%s391_s0 + $0x20] sm:$0xff]  ;;  %v21_v46 = vld [vmem:[%s391_s0 + $0x38] sm:$0xff]  ;;  %v24_v47 = vld [vmem:[%s391_s0 + $0x50] sm:$0xff] }
  0x11   :  { %115 = vmatpush.msra.mxu1 %v50_v19  ;;  %v202_v49 = vld [vmem:[%s392_s2] ss:$0 sm:$0xff] }
  0x12   :  { %87 = vmatpush.msra.mxu0 %v33_v21  ;;  %194 = vmatpush.msra.mxu3 %v33_v21 }
  0x13   :  { %116 = vmatpush.msra.mxu1 %v49_v22 }
  0x14   :  { %88 = vmatpush.msra.mxu0 %v32_v23  ;;  %195 = vmatpush.msra.mxu3 %v32_v23 }
  0x15   :  { %117 = vmatpush.msra.mxu1 %v48_v24 }
  0x16   :  { %89 = vmatpush.msra.mxu0 %v31_v25  ;;  %196 = vmatpush.msra.mxu3 %v31_v25 }
  0x17   :  { %118 = vmatpush.msra.mxu1 %v47_v26  ;;  %183 = vmatmul.msk.f32.gmra.mxu2 %vm66_vm0, %v19_v29 }
  0x18   :  { %90 = vmatpush.msra.mxu0 %v30_v27  ;;  %197 = vmatpush.msra.mxu3 %v30_v27 }
  0x19   :  { %119 = vmatpush.msra.mxu1 %v46_v28 }
  0x1a   :  { %91 = vmatpush.msra.mxu0 %v29_v30  ;;  %198 = vmatpush.msra.mxu3 %v29_v30 }
  0x1b   :  { %120 = vmatpush.msra.mxu1 %v45_v31 }
  0x1c   :  { %92 = vmatpush.msra.mxu0 %v28_v32  ;;  %199 = vmatpush.msra.mxu3 %v28_v32 }
  0x1d   :  { %121 = vmatpush.msra.mxu1 %v44_v33 }
  0x1e   :  { %93 = vmatpush.msra.mxu0 %v27_v34  ;;  %200 = vmatpush.msra.mxu3 %v27_v34 }
  0x1f   :  { %122 = vmatpush.msra.mxu1 %v43_v35  ;;  %184 = vmatmul.msk.f32.gmra.mxu2 %vm66_vm0, %v22_v41 }
  0x20   :  { %94 = vmatpush.msra.mxu0 %v26_v36  ;;  %201 = vmatpush.msra.mxu3 %v26_v36 }
  0x21   :  { %123 = vmatpush.msra.mxu1 %v42_v37  ;;  %95 = vmatmul.f32.vlgmr.msra.gmra.mxu0 %v14_v38 }
  0x22   :  { %98 = vmatmul.f32.vlgmr.msra.gmra.mxu3 %v17_v39  ;;  %124 = vmatmul.f32.vlgmr.msra.gmra.mxu1 %v15_v40 }
  0x27   :  { %185 = vmatmul.msk.f32.gmra.mxu2 %vm66_vm0, %v25_v44 }
  0x2a   :  { %101 = vmatmul.f32.gmra.mxu3 %v20_v42  ;;  %127 = vmatmul.f32.gmra.mxu1 %v18_v43 }
  0x32   :  { %104 = vmatmul.f32.gmra.mxu3 %v23_v45  ;;  %130 = vmatmul.f32.gmra.mxu1 %v21_v46 }
  0x3a   :  { %133 = vmatmul.f32.gmra.mxu1 %v24_v47 }
  0x92   :  { %v154_v48 = vpop.f32.mrf.mxu2 }
  0x9a   :  { %v157_v55 = vpop.f32.mrf.mxu2 }
  0x9e   :  { %v96_v50 = vpop.f32.mrf.mxu0 }
  0x9f   :  { %v97_v51 = vadd.f32 %v202_v49, %v96_v50  ;;  %v125_v52 = vpop.f32.mrf.mxu1 }
  0xa1   :  { %v126_v53 = vadd.f32 %v125_v52, %v97_v51 }
  0xa2   :  { %v160_v1 = vpop.f32.mrf.mxu2 }
  0xa3   :  { %v155_v54 = vadd.f32 %v154_v48, %v126_v53 }
  0xa5   :  { %v166_v56 = vmul.f32 0.01, %v155_v54  ;;  %v99_v57 = vpop.f32.mrf.mxu3 }
  0xa6   :  { %v100_v58 = vadd.f32 %v202_v49, %v99_v57 }
  0xa7   :  { %v170_v59 = vmax.f32 %v155_v54, %v166_v56  ;;  %v128_v60 = vpop.f32.mrf.mxu1 }
  0xa8   :  { %v129_v61 = vadd.f32 %v128_v60, %v100_v58 }
  0xa9   :  { %174 = vst.msk [vmem:[%s393_s3] sm:$0xff] %vm66_vm0, %v170_v59 }
  0xaa   :  { %v158_v62 = vadd.f32 %v157_v55, %v129_v61  ;;  %v163_v12 = vpop.f32.mrf.mxu2 }
  0xac   :  { %v167_v63 = vmul.f32 0.01, %v158_v62 }
  0xad   :  { %v102_v0 = vpop.f32.mrf.mxu3 }
  0xae   :  { %v171_v2 = vmax.f32 %v158_v62, %v167_v63  ;;  %v103_v3 = vadd.f32 %v202_v49, %v102_v0 }
  0xaf   :  { %v131_v4 = vpop.f32.mrf.mxu1 }
  0xb0   :  { %175 = vst.msk [vmem:[%s393_s3 + $0x8] sm:$0xff] %vm66_vm0, %v171_v2  ;;  %v132_v5 = vadd.f32 %v131_v4, %v103_v3 }
  0xb2   :  { %v161_v6 = vadd.f32 %v160_v1, %v132_v5 }
  0xb4   :  { %v168_v7 = vmul.f32 0.01, %v161_v6 }
  0xb5   :  { %v105_v8 = vpop.f32.mrf.mxu3 }
  0xb6   :  { %v172_v9 = vmax.f32 %v161_v6, %v168_v7  ;;  %v106_v10 = vadd.f32 %v202_v49, %v105_v8 }
  0xb7   :  { %v134_v11 = vpop.f32.mrf.mxu1 }
  0xb8   :  { %176 = vst.msk [vmem:[%s393_s3 + $0x10] sm:$0xff] %vm66_vm0, %v172_v9  ;;  %v135_v13 = vadd.f32 %v134_v11, %v106_v10 }
  0xba   :  { %v164_v14 = vadd.f32 %v163_v12, %v135_v13 }
  0xbc   :  { %v169_v15 = vmul.f32 0.01, %v164_v14 }
  0xbe   :  { %v173_v16 = vmax.f32 %v164_v14, %v169_v15 }
  0xc0   :  { %177 = vst.msk [vmem:[%s393_s3 + $0x18] sm:$0xff] %vm66_vm0, %v173_v16 }

// kernel: _lambda_.6
= control target key start
LH: loop header
LB: loop body
LE: loop exit
PB: predicated region body
PF: predicated region fallthrough
CT: control target
= control target key end

     0   :  { %vm57_vm0 = vcmask 261120   ;;  %s275_s1 = inlined_call_operand.vmem [shape: f32[288,32], index: 1, kind: input, shape index: {}]   ;;  %s276_s0 = inlined_call_operand.vmem [shape: f32[8,288], index: 0, kind: input, shape index: {}]   ;;  %s277_s2 = inlined_call_operand.vmem [shape: f32[1,32], index: 2, kind: input, shape index: {}]   ;;  %s278_s3 = inlined_call_operand.vmem [shape: f32[8,32], index: 3, kind: output, shape index: {}]  }
   0x1   :  { %v32_v0 = vld [vmem:[%s275_s1 + $0x78] sm:$0xff]  ;;  %v31_v1 = vld [vmem:[%s275_s1 + $0x70] sm:$0xff]  ;;  %v30_v4 = vld [vmem:[%s275_s1 + $0x68] sm:$0xff] }
   0x2   :  { %v48_v2 = vld [vmem:[%s275_s1 + $0xf8] sm:$0xff]  ;;  %61 = vmatpush.msra.mxu0 %v32_v0  ;;  %v47_v3 = vld [vmem:[%s275_s1 + $0xf0] sm:$0xff]  ;;  %v46_v5 = vld [vmem:[%s275_s1 + $0xe8] sm:$0xff] }
   0x3   :  { %81 = vmatpush.msra.mxu1 %v48_v2  ;;  %v29_v6 = vld [vmem:[%s275_s1 + $0x60] sm:$0xff]  ;;  %v28_v8 = vld [vmem:[%s275_s1 + $0x58] sm:$0xff]  ;;  %v27_v11 = vld [vmem:[%s275_s1 + $0x50] sm:$0xff] }
   0x4   :  { %62 = vmatpush.msra.mxu0 %v31_v1  ;;  %v45_v7 = vld [vmem:[%s275_s1 + $0xe0] sm:$0xff]  ;;  %v44_v9 = vld [vmem:[%s275_s1 + $0xd8] sm:$0xff]  ;;  %v43_v12 = vld [vmem:[%s275_s1 + $0xd0] sm:$0xff] }
   0x5   :  { %82 = vmatpush.msra.mxu1 %v47_v3  ;;  %v52_v10 = vld [vmem:[%s275_s1 + $0x118] sm:$0xff]  ;;  %v51_v13 = vld [vmem:[%s275_s1 + $0x110] sm:$0xff]  ;;  %v50_v14 = vld [vmem:[%s275_s1 + $0x108] sm:$0xff] }
   0x6   :  { %63 = vmatpush.msra.mxu0 %v30_v4  ;;  %113 = vmatpush.msra.mxu2 %v52_v10  ;;  %v26_v15 = vld [vmem:[%s275_s1 + $0x48] sm:$0xff]  ;;  %v49_v17 = vld [vmem:[%s275_s1 + $0x100] sm:$0xff]  ;;  %v16_v20 = vld [vmem:[%s276_s0 + $0x10] sm:$0xff] }
   0x7   :  { %83 = vmatpush.msra.mxu1 %v46_v5  ;;  %v42_v16 = vld [vmem:[%s275_s1 + $0xc8] sm:$0xff]  ;;  %v25_v18 = vld [vmem:[%s275_s1 + $0x40] sm:$0xff]  ;;  %v24_v21 = vld [vmem:[%s275_s1 + $0x38] sm:$0xff] }
   0x8   :  { %64 = vmatpush.msra.mxu0 %v29_v6  ;;  %114 = vmatpush.msra.mxu2 %v51_v13  ;;  %v41_v19 = vld [vmem:[%s275_s1 + $0xc0] sm:$0xff]  ;;  %v40_v22 = vld [vmem:[%s275_s1 + $0xb8] sm:$0xff]  ;;  %v23_v23 = vld [vmem:[%s275_s1 + $0x30] sm:$0xff] }
   0x9   :  { %84 = vmatpush.msra.mxu1 %v45_v7  ;;  %v39_v24 = vld [vmem:[%s275_s1 + $0xb0] sm:$0xff]  ;;  %v22_v25 = vld [vmem:[%s275_s1 + $0x28] sm:$0xff]  ;;  %v21_v27 = vld [vmem:[%s275_s1 + $0x20] sm:$0xff] }
   0xa   :  { %65 = vmatpush.msra.mxu0 %v28_v8  ;;  %115 = vmatpush.msra.mxu2 %v50_v14  ;;  %v38_v26 = vld [vmem:[%s275_s1 + $0xa8] sm:$0xff]  ;;  %v37_v28 = vld [vmem:[%s275_s1 + $0xa0] sm:$0xff]  ;;  %v20_v29 = vld [vmem:[%s275_s1 + $0x18] sm:$0xff] }
   0xb   :  { %85 = vmatpush.msra.mxu1 %v44_v9  ;;  %v36_v30 = vld [vmem:[%s275_s1 + $0x98] sm:$0xff]  ;;  %v19_v31 = vld [vmem:[%s275_s1 + $0x10] sm:$0xff]  ;;  %v18_v33 = vld [vmem:[%s275_s1 + $0x8] sm:$0xff] }
   0xc   :  { %66 = vmatpush.msra.mxu0 %v27_v11  ;;  %116 = vmatpush.msra.mxu2 %v49_v17  ;;  %v35_v32 = vld [vmem:[%s275_s1 + $0x90] sm:$0xff]  ;;  %v34_v34 = vld [vmem:[%s275_s1 + $0x88] sm:$0xff]  ;;  %v17_v35 = vld [vmem:[%s275_s1] sm:$0xff] }
   0xd   :  { %86 = vmatpush.msra.mxu1 %v43_v12  ;;  %128 = vmatmul.msk.f32.vlgmr.msra.gmra.mxu2 %vm57_vm0, %v16_v20  ;;  %v33_v36 = vld [vmem:[%s275_s1 + $0x80] sm:$0xff]  ;;  %v15_v38 = vld [vmem:[%s276_s0 + $0x8] sm:$0xff] }
   0xe   :  { %67 = vmatpush.msra.mxu0 %v26_v15  ;;  %v14_v37 = vld [vmem:[%s276_s0] sm:$0xff] }
   0xf   :  { %87 = vmatpush.msra.mxu1 %v42_v16  ;;  %v129_v39 = vld [vmem:[%s277_s2] ss:$0 sm:$0xff] }
  0x10   :  { %68 = vmatpush.msra.mxu0 %v25_v18 }
  0x11   :  { %88 = vmatpush.msra.mxu1 %v41_v19 }
  0x12   :  { %69 = vmatpush.msra.mxu0 %v24_v21 }
  0x13   :  { %89 = vmatpush.msra.mxu1 %v40_v22 }
  0x14   :  { %70 = vmatpush.msra.mxu0 %v23_v23 }
  0x15   :  { %90 = vmatpush.msra.mxu1 %v39_v24 }
  0x16   :  { %71 = vmatpush.msra.mxu0 %v22_v25 }
  0x17   :  { %91 = vmatpush.msra.mxu1 %v38_v26 }
  0x18   :  { %72 = vmatpush.msra.mxu0 %v21_v27 }
  0x19   :  { %92 = vmatpush.msra.mxu1 %v37_v28 }
  0x1a   :  { %73 = vmatpush.msra.mxu0 %v20_v29 }
  0x1b   :  { %93 = vmatpush.msra.mxu1 %v36_v30 }
  0x1c   :  { %74 = vmatpush.msra.mxu0 %v19_v31 }
  0x1d   :  { %94 = vmatpush.msra.mxu1 %v35_v32 }
  0x1e   :  { %75 = vmatpush.msra.mxu0 %v18_v33 }
  0x1f   :  { %95 = vmatpush.msra.mxu1 %v34_v34 }
  0x20   :  { %76 = vmatpush.msra.mxu0 %v17_v35 }
  0x21   :  { %96 = vmatpush.msra.mxu1 %v33_v36  ;;  %77 = vmatmul.f32.vlgmr.msra.gmra.mxu0 %v14_v37 }
  0x22   :  { %97 = vmatmul.f32.vlgmr.msra.gmra.mxu1 %v15_v38 }
  0x90   :  { %v118_v43 = vpop.f32.mrf.mxu2 }
  0x9e   :  { %v78_v40 = vpop.f32.mrf.mxu0 }
  0x9f   :  { %v98_v41 = vpop.f32.mrf.mxu1  ;;  %v79_v42 = vadd.f32 %v129_v39, %v78_v40 }
  0xa1   :  { %v99_v44 = vadd.f32 %v98_v41, %v79_v42 }
  0xa3   :  { %v119_v45 = vadd.f32 %v118_v43, %v99_v44 }
  0xa5   :  { %v121_v46 = vmul.f32 0.01, %v119_v45 }
  0xa7   :  { %v122_v47 = vmax.f32 %v119_v45, %v121_v46 }
  0xa9   :  { %123 = vst.msk [vmem:[%s278_s3] sm:$0xff] %vm57_vm0, %v122_v47 }

// kernel: _lambda_.7
= control target key start
LH: loop header
LB: loop body
LE: loop exit
PB: predicated region body
PF: predicated region fallthrough
CT: control target
= control target key end

     0   :  { %s379_s0 = inlined_call_operand.vmem [shape: f32[2,288], index: 0, kind: input, shape index: {}]   ;;  %s380_s1 = inlined_call_operand.vmem [shape: f32[288,32], index: 1, kind: input, shape index: {}]   ;;  %s381_s2 = inlined_call_operand.vmem [shape: f32[1,32], index: 2, kind: input, shape index: {}]   ;;  %s382_s3 = inlined_call_operand.vmem [shape: f32[32,32], index: 3, kind: input, shape index: {}]   ;;  %s383_s4 = inlined_call_operand.vmem [shape: f32[1,32], index: 4, kind: input, shape index: {}]   ;;  %s384_s5 = inlined_call_operand.hbm [shape: f32[2,32], index: 5, kind: output, shape index: {}]  }
   0x1   :  { %v37_v0 = vld [vmem:[%s380_s1 + $0x78] sm:$0xff]  ;;  %v36_v1 = vld [vmem:[%s380_s1 + $0x70] sm:$0xff]  ;;  %v35_v4 = vld [vmem:[%s380_s1 + $0x68] sm:$0xff] }
   0x2   :  { %v53_v2 = vld [vmem:[%s380_s1 + $0xf8] sm:$0xff]  ;;  %72 = vmatpush.msra.mxu0 %v37_v0  ;;  %v52_v3 = vld [vmem:[%s380_s1 + $0xf0] sm:$0xff]  ;;  %v51_v5 = vld [vmem:[%s380_s1 + $0xe8] sm:$0xff] }
   0x3   :  { %92 = vmatpush.msra.mxu1 %v53_v2  ;;  %v34_v6 = vld [vmem:[%s380_s1 + $0x60] sm:$0xff]  ;;  %v33_v8 = vld [vmem:[%s380_s1 + $0x58] sm:$0xff]  ;;  %v32_v11 = vld [vmem:[%s380_s1 + $0x50] sm:$0xff] }
   0x4   :  { %73 = vmatpush.msra.mxu0 %v36_v1  ;;  %v50_v7 = vld [vmem:[%s380_s1 + $0xe0] sm:$0xff]  ;;  %v49_v9 = vld [vmem:[%s380_s1 + $0xd8] sm:$0xff]  ;;  %v48_v12 = vld [vmem:[%s380_s1 + $0xd0] sm:$0xff] }
   0x5   :  { %93 = vmatpush.msra.mxu1 %v52_v3  ;;  %v57_v10 = vld [vmem:[%s380_s1 + $0x118] sm:$0xff]  ;;  %v56_v13 = vld [vmem:[%s380_s1 + $0x110] sm:$0xff]  ;;  %v55_v14 = vld [vmem:[%s380_s1 + $0x108] sm:$0xff] }
   0x6   :  { %74 = vmatpush.msra.mxu0 %v35_v4  ;;  %124 = vmatpush.msra.mxu2 %v57_v10  ;;  %v31_v15 = vld [vmem:[%s380_s1 + $0x48] sm:$0xff]  ;;  %v54_v17 = vld [vmem:[%s380_s1 + $0x100] sm:$0xff] }
   0x7   :  { %94 = vmatpush.msra.mxu1 %v51_v5  ;;  %v47_v16 = vld [vmem:[%s380_s1 + $0xc8] sm:$0xff]  ;;  %v21_v18 = vld [vmem:[%s379_s0] sm:$0x3f] }
   0x8   :  { %75 = vmatpush.msra.mxu0 %v34_v6  ;;  %125 = vmatpush.msra.mxu2 %v56_v13  ;;  %v30_v19 = vld [vmem:[%s380_s1 + $0x40] sm:$0xff]  ;;  %63 = vst [vmem:[#allocation1] ss:$4 sm:$0xff] %v21_v18 }
   0x9   :  { %95 = vmatpush.msra.mxu1 %v50_v7  ;;  %v46_v20 = vld [vmem:[%s380_s1 + $0xc0] sm:$0xff] }
   0xa   :  { %76 = vmatpush.msra.mxu0 %v33_v8  ;;  %126 = vmatpush.msra.mxu2 %v55_v14 }
   0xb   :  { %96 = vmatpush.msra.mxu1 %v49_v9 }
   0xc   :  { %77 = vmatpush.msra.mxu0 %v32_v11 }
   0xd   :  { %97 = vmatpush.msra.mxu1 %v48_v12 }
   0xe   :  { %78 = vmatpush.msra.mxu0 %v31_v15 }
   0xf   :  { %98 = vmatpush.msra.mxu1 %v47_v16 }
  0x10   :  { %10 = vsyncpa [#allocation3], 0  ;;  %v29_v21 = vld [vmem:[%s380_s1 + $0x38] sm:$0xff]  ;;  %127 = vmatpush.msra.mxu2 %v54_v17  ;;  %79 = vmatpush.msra.mxu0 %v30_v19  ;;  %v28_v23 = vld [vmem:[%s380_s1 + $0x30] sm:$0xff]  ;;  %vm69_vm0 = vcmask 261120   ;;  %vm165_vm1 = vcmask 254976  }
  0x11   :  { %v45_v22 = vld [vmem:[%s380_s1 + $0xb8] sm:$0xff]  ;;  %99 = vmatpush.msra.mxu1 %v46_v20  ;;  %v44_v24 = vld [vmem:[%s380_s1 + $0xb0] sm:$0xff]  ;;  %v27_v25 = vld [vmem:[%s380_s1 + $0x28] sm:$0xff] }
  0x12   :  { %80 = vmatpush.msra.mxu0 %v29_v21  ;;  %v43_v26 = vld [vmem:[%s380_s1 + $0xa8] sm:$0xff]  ;;  %v66_v27 = vld.sshfl [vmem:[#allocation1 + $0x10] sm:$0xff pattern:$0x73625140]  ;;  %v26_v28 = vld [vmem:[%s380_s1 + $0x20] sm:$0xff] }
  0x13   :  { %100 = vmatpush.msra.mxu1 %v45_v22  ;;  %v42_v29 = vld [vmem:[%s380_s1 + $0xa0] sm:$0xff]  ;;  %183 = vmatmul.msk.f32.vlgmr.msra.gmra.mxu2 %vm69_vm0, %v66_v27  ;;  %v25_v30 = vld [vmem:[%s380_s1 + $0x18] sm:$0xff]  ;;  %v24_v32 = vld [vmem:[%s380_s1 + $0x10] sm:$0xff] }
  0x14   :  { %81 = vmatpush.msra.mxu0 %v28_v23  ;;  %v41_v31 = vld [vmem:[%s380_s1 + $0x98] sm:$0xff]  ;;  %v40_v33 = vld [vmem:[%s380_s1 + $0x90] sm:$0xff]  ;;  %v23_v34 = vld [vmem:[%s380_s1 + $0x8] sm:$0xff] }
  0x15   :  { %101 = vmatpush.msra.mxu1 %v44_v24  ;;  %v39_v35 = vld [vmem:[%s380_s1 + $0x88] sm:$0xff]  ;;  %v22_v36 = vld [vmem:[%s380_s1] sm:$0xff]  ;;  %v137_v40 = vld [vmem:[%s382_s3 + $0x18] sm:$0xff] }
  0x16   :  { %82 = vmatpush.msra.mxu0 %v27_v25  ;;  %v38_v37 = vld [vmem:[%s380_s1 + $0x80] sm:$0xff]  ;;  %v65_v39 = vld.sshfl [vmem:[#allocation1 + $0x8] sm:$0xff pattern:$0x73625140]  ;;  %157 = vmatpush.msra.mxu3 %v137_v40  ;;  %v136_v41 = vld [vmem:[%s382_s3 + $0x10] sm:$0xff] }
  0x17   :  { %102 = vmatpush.msra.mxu1 %v43_v26  ;;  %v64_v38 = vld.sshfl [vmem:[#allocation1] sm:$0xff pattern:$0x73625140]  ;;  %v135_v42 = vld [vmem:[%s382_s3 + $0x8] sm:$0xff] }
  0x18   :  { %83 = vmatpush.msra.mxu0 %v26_v28  ;;  %158 = vmatpush.msra.mxu3 %v136_v41  ;;  %v134_v43 = vld [vmem:[%s382_s3] sm:$0xff]  ;;  %s214_s3 = smov [#allocation2]  }
  0x19   :  { %103 = vmatpush.msra.mxu1 %v42_v29  ;;  %v186_v44 = vld [vmem:[%s381_s2] ss:$0 sm:$0xff]  ;;  %s172_s26 = sshll.u32 %s214_s3, 4  ;;  %s174_s2 = sshll.u32 %s384_s5, 4  ;;  %s173_s26 = int_to_ptr.vmem [resolvable:$true] %s172_s26  ;;  %s175_s2 = int_to_ptr.hbm [resolvable:$true] %s174_s2 }
  0x1a   :  { %84 = vmatpush.msra.mxu0 %v25_v30  ;;  %159 = vmatpush.msra.mxu3 %v135_v42  ;;  %v187_v53 = vld [vmem:[%s383_s4] ss:$0 sm:$0xff] }
  0x1b   :  { %104 = vmatpush.msra.mxu1 %v41_v31 }
  0x1c   :  { %85 = vmatpush.msra.mxu0 %v24_v32  ;;  %160 = vmatpush.msra.mxu3 %v134_v43 }
  0x1d   :  { %105 = vmatpush.msra.mxu1 %v40_v33 }
  0x1e   :  { %86 = vmatpush.msra.mxu0 %v23_v34 }
  0x1f   :  { %106 = vmatpush.msra.mxu1 %v39_v35 }
  0x20   :  { %87 = vmatpush.msra.mxu0 %v22_v36 }
  0x21   :  { %107 = vmatpush.msra.mxu1 %v38_v37  ;;  %88 = vmatmul.f32.vlgmr.msra.gmra.mxu0 %v64_v38 }
  0x22   :  { %108 = vmatmul.f32.vlgmr.msra.gmra.mxu1 %v65_v39 }
  0x96   :  { %v129_v48 = vpop.f32.mrf.mxu2 }
  0x9e   :  { %v89_v45 = vpop.f32.mrf.mxu0 }
  0x9f   :  { %v109_v46 = vpop.f32.mrf.mxu1  ;;  %v90_v47 = vadd.f32 %v186_v44, %v89_v45 }
  0xa1   :  { %v110_v49 = vadd.f32 %v109_v46, %v90_v47 }
  0xa3   :  { %v130_v50 = vadd.f32 %v129_v48, %v110_v49 }
  0xa5   :  { %v132_v51 = vmul.f32 0.01, %v130_v50 }
  0xa7   :  { %v133_v52 = vmax.f32 %v130_v50, %v132_v51 }
  0xa9   :  { %184 = vmatmul.msk.f32.vlgmr.msra.gmra.mxu3 %vm69_vm0, %v133_v52 }
 0x12c   :  { %v162_v54 = vpop.f32.mrf.mxu3 }
 0x12d   :  { %v163_v55 = vadd.f32 %v187_v53, %v162_v54 }
 0x12f   :  { %166 = vst.msk [vmem:[#allocation2] sm:$0x3] %vm165_vm1, %v163_v55 }
 0x130   :  { %177 = dma.vmem_to_hbm [thread:$0]  %s173_s26, 32, %s175_s2, [#allocation3]  }
 0x131   :  { %212 = dma.done.wait [#allocation3], 32  }
 0x132   :  { %213 = vsyncadd [#allocation3], 4294967264 }
 0x133   :  { %182 = vsyncpa [#allocation3], 1 }

</bundles_post_ra>
